<compile_context>
chip_gen: v5e
topology: v5e:2x2
jax: 0.10.0
libtpu: 0.0.40
codegen_flags: <defaults>
</compile_context>

<pallas_src>
import jax
import jax.numpy as jnp
from jax.experimental import pallas as pl
from jax.experimental.pallas import tpu as pltpu

IN_F = 2
OUT_F = 3
REPEAT = 3                      # torch.stack((y, y, y), dim=1)
OUTW = REPEAT * OUT_F           # flattened output width = 9


def linear_stack_flatten_kernel(w_ref, b_ref, x_ref, o_ref):
    # w_ref: SMEM (OUT_F, IN_F) scalars   b_ref: SMEM (OUT_F,) scalars
    # x_ref: VMEM (IN_F, TB)  batch on the lane axis
    # o_ref: VMEM (OUTW, TB)  lane-dense output block
    rows = []
    for j in range(OUT_F):                                  # static unroll (3)
        acc = b_ref[j] + w_ref[j, 0] * x_ref[0:1, :]        # (1, TB)
        for k in range(1, IN_F):                            # static unroll (2)
            acc = acc + w_ref[j, k] * x_ref[k:k + 1, :]
        rows.append(acc)
    y = jnp.concatenate(rows, axis=0)                       # (OUT_F, TB) unique rows
    # stack((y,y,y),dim=1).flatten(1) == rows [y0,y1,y2, y0,y1,y2, y0,y1,y2]
    # in the transposed layout: pure sublane replication, no recompute.
    o_ref[...] = jnp.concatenate([y, y, y], axis=0)         # (OUTW, TB)


def model_forward(x, w, b):
    """x: (B, IN_F) f32, w: (OUT_F, IN_F) as in nn.Linear, b: (OUT_F,) f32."""
    B = x.shape[0]
    x_t = x.T                                   # (IN_F, B): lane-dense plumbing

    # Lane-dimension (batch) tiling.
    if B <= 8192:
        TB, Bp = B, B                           # full-extent block (exempt from (8,128))
    else:
        TB = 65536                              # ~2.9 MiB/buffer set at f32
        while TB * 2 > B:                       # >=2 grid steps -> v7x megacore
            TB //= 2
        TB = max(TB, 128)                       # 128-multiple lane tile
        Bp = pl.cdiv(B, TB) * TB
    if Bp != B:
        x_t = jnp.pad(x_t, ((0, 0), (0, Bp - B)))

    grid = (Bp // TB,)

    cost = pl.CostEstimate(
        flops=2 * B * IN_F * OUT_F,
        transcendentals=0,
        bytes_accessed=4 * (B * IN_F + w.size + b.size + B * OUTW),
    )

    out_t = pl.pallas_call(
        linear_stack_flatten_kernel,
        out_shape=jax.ShapeDtypeStruct((OUTW, Bp), jnp.float32),
        grid=grid,
        in_specs=[
            pl.BlockSpec(memory_space=pltpu.MemorySpace.SMEM),   # w scalars
            pl.BlockSpec(memory_space=pltpu.MemorySpace.SMEM),   # b scalars
            pl.BlockSpec((IN_F, TB), lambda i: (0, i)),          # x_t tile
        ],
        out_specs=pl.BlockSpec((OUTW, TB), lambda i: (0, i)),
        compiler_params=pltpu.CompilerParams(
            dimension_semantics=("parallel",),
            vmem_limit_bytes=32 * 1024 * 1024,   # headroom on v5e's 16 MiB default
        ),
        cost_estimate=cost,
    )(w, b, x_t)

    return out_t[:, :B].T                        # back to (B, OUTW) row-major


if __name__ == "__main__":
    key = jax.random.PRNGKey(0)
    kx, kw, kb = jax.random.split(key, 3)

    # deterministic inputs / params (nn.Linear(2, 3): weight (3,2), bias (3,))
    x = jax.random.normal(kx, (2, IN_F), dtype=jnp.float32)
    bound = 1.0 / (IN_F ** 0.5)
    w = jax.random.uniform(kw, (OUT_F, IN_F), minval=-bound, maxval=bound,
                           dtype=jnp.float32)
    b = jax.random.uniform(kb, (OUT_F,), minval=-bound, maxval=bound,
                           dtype=jnp.float32)

    out = model_forward(x, w, b)
    jax.block_until_ready(out)

    # reference check in plain JAX (mirrors the PyTorch forward)
    y_ref = x @ w.T + b
    ref = jnp.reshape(jnp.stack((y_ref, y_ref, y_ref), axis=1),
                      (x.shape[0], -1))
    assert out.shape == (x.shape[0], OUTW)
    assert jnp.allclose(out, ref, atol=1e-5), "mismatch vs reference"

    print("KERNEL_OK")
</pallas_src>

<mosaic_0001>
module attributes {stable_mosaic.version = 11 : i64} {
  func.func @linear_stack_flatten_kernel(%arg0: i32, %arg1: memref<3x2xf32, #tpu.memory_space<smem>>, %arg2: memref<3xf32, #tpu.memory_space<smem>>, %arg3: memref<2x2xf32, #tpu.memory_space<vmem>>, %arg4: memref<9x2xf32, #tpu.memory_space<vmem>>) attributes {dimension_semantics = [#tpu.dimension_semantics<parallel>], iteration_bounds = array<i64: 1>, scalar_prefetch = 0 : i64, scratch_operands = 0 : i64, tpu.core_type = #tpu.core_type<tc>, window_params = [{transform_indices = @transform_0, window_bounds = array<i64: 3, 2>}, {transform_indices = @transform_1, window_bounds = array<i64: 3>}, {transform_indices = @transform_2, window_bounds = array<i64: 2, 2>}, {transform_indices = @transform_3, window_bounds = array<i64: 9, 2>}]} {
    %c0 = arith.constant 0 : index
    %0 = memref.load %arg2[%c0] : memref<3xf32, #tpu.memory_space<smem>>
    %c0_0 = arith.constant 0 : index
    %c0_1 = arith.constant 0 : index
    %1 = memref.load %arg1[%c0_0, %c0_1] : memref<3x2xf32, #tpu.memory_space<smem>>
    %c0_2 = arith.constant 0 : index
    %c0_3 = arith.constant 0 : index
    %2 = vector.load %arg3[%c0_2, %c0_3] : memref<2x2xf32, #tpu.memory_space<vmem>>, vector<1x2xf32>
    %3 = vector.broadcast %1 : f32 to vector<1x2xf32>
    %4 = arith.mulf %3, %2 : vector<1x2xf32>
    %5 = vector.broadcast %0 : f32 to vector<1x2xf32>
    %6 = arith.addf %5, %4 : vector<1x2xf32>
    %c0_4 = arith.constant 0 : index
    %c1 = arith.constant 1 : index
    %7 = memref.load %arg1[%c0_4, %c1] : memref<3x2xf32, #tpu.memory_space<smem>>
    %c1_5 = arith.constant 1 : index
    %c0_6 = arith.constant 0 : index
    %8 = vector.load %arg3[%c1_5, %c0_6] : memref<2x2xf32, #tpu.memory_space<vmem>>, vector<1x2xf32>
    %9 = vector.broadcast %7 : f32 to vector<1x2xf32>
    %10 = arith.mulf %9, %8 : vector<1x2xf32>
    %11 = arith.addf %6, %10 : vector<1x2xf32>
    %c1_7 = arith.constant 1 : index
    %12 = memref.load %arg2[%c1_7] : memref<3xf32, #tpu.memory_space<smem>>
    %c1_8 = arith.constant 1 : index
    %c0_9 = arith.constant 0 : index
    %13 = memref.load %arg1[%c1_8, %c0_9] : memref<3x2xf32, #tpu.memory_space<smem>>
    %c0_10 = arith.constant 0 : index
    %c0_11 = arith.constant 0 : index
    %14 = vector.load %arg3[%c0_10, %c0_11] : memref<2x2xf32, #tpu.memory_space<vmem>>, vector<1x2xf32>
    %15 = vector.broadcast %13 : f32 to vector<1x2xf32>
    %16 = arith.mulf %15, %14 : vector<1x2xf32>
    %17 = vector.broadcast %12 : f32 to vector<1x2xf32>
    %18 = arith.addf %17, %16 : vector<1x2xf32>
    %c1_12 = arith.constant 1 : index
    %c1_13 = arith.constant 1 : index
    %19 = memref.load %arg1[%c1_12, %c1_13] : memref<3x2xf32, #tpu.memory_space<smem>>
    %c1_14 = arith.constant 1 : index
    %c0_15 = arith.constant 0 : index
    %20 = vector.load %arg3[%c1_14, %c0_15] : memref<2x2xf32, #tpu.memory_space<vmem>>, vector<1x2xf32>
    %21 = vector.broadcast %19 : f32 to vector<1x2xf32>
    %22 = arith.mulf %21, %20 : vector<1x2xf32>
    %23 = arith.addf %18, %22 : vector<1x2xf32>
    %c2 = arith.constant 2 : index
    %24 = memref.load %arg2[%c2] : memref<3xf32, #tpu.memory_space<smem>>
    %c2_16 = arith.constant 2 : index
    %c0_17 = arith.constant 0 : index
    %25 = memref.load %arg1[%c2_16, %c0_17] : memref<3x2xf32, #tpu.memory_space<smem>>
    %c0_18 = arith.constant 0 : index
    %c0_19 = arith.constant 0 : index
    %26 = vector.load %arg3[%c0_18, %c0_19] : memref<2x2xf32, #tpu.memory_space<vmem>>, vector<1x2xf32>
    %27 = vector.broadcast %25 : f32 to vector<1x2xf32>
    %28 = arith.mulf %27, %26 : vector<1x2xf32>
    %29 = vector.broadcast %24 : f32 to vector<1x2xf32>
    %30 = arith.addf %29, %28 : vector<1x2xf32>
    %c2_20 = arith.constant 2 : index
    %c1_21 = arith.constant 1 : index
    %31 = memref.load %arg1[%c2_20, %c1_21] : memref<3x2xf32, #tpu.memory_space<smem>>
    %c1_22 = arith.constant 1 : index
    %c0_23 = arith.constant 0 : index
    %32 = vector.load %arg3[%c1_22, %c0_23] : memref<2x2xf32, #tpu.memory_space<vmem>>, vector<1x2xf32>
    %33 = vector.broadcast %31 : f32 to vector<1x2xf32>
    %34 = arith.mulf %33, %32 : vector<1x2xf32>
    %35 = arith.addf %30, %34 : vector<1x2xf32>
    %36 = tpu.concatenate %11, %23, %35 in 0 : vector<1x2xf32>, vector<1x2xf32>, vector<1x2xf32> -> vector<3x2xf32>
    %37 = tpu.concatenate %36, %36, %36 in 0 : vector<3x2xf32>, vector<3x2xf32>, vector<3x2xf32> -> vector<9x2xf32>
    %c0_24 = arith.constant 0 : index
    %c0_25 = arith.constant 0 : index
    %38 = vector.load %arg4[%c0_24, %c0_25] : memref<9x2xf32, #tpu.memory_space<vmem>>, vector<9x2xf32>
    tpu.vector_store %arg4[%c0_24, %c0_25], %37 {strides = array<i32>} : memref<9x2xf32, #tpu.memory_space<vmem>>, vector<9x2xf32>,
    return
  }
  func.func @transform_0(%arg0: i32) -> (i32, i32) {
    %c0_i32 = arith.constant 0 : i32
    %c0_i32_0 = arith.constant 0 : i32
    %c0_i32_1 = arith.constant 0 : i32
    return %c0_i32, %c0_i32_0 : i32, i32
  }
  func.func @transform_1(%arg0: i32) -> i32 {
    %c0_i32 = arith.constant 0 : i32
    %c0_i32_0 = arith.constant 0 : i32
    return %c0_i32 : i32
  }
  func.func @transform_2(%arg0: i32) -> (i32, i32) {
    %c0_i32 = arith.constant 0 : i32
    %c0_i32_0 = arith.constant 0 : i32
    return %c0_i32, %arg0 : i32, i32
  }
  func.func @transform_3(%arg0: i32) -> (i32, i32) {
    %c0_i32 = arith.constant 0 : i32
    %c0_i32_0 = arith.constant 0 : i32
    return %c0_i32, %arg0 : i32, i32
  }
}

</mosaic_0001>

<bundles_post_ra>
// kernel: tpu_custom_call.1
= control target key start
LH: loop header
LB: loop body
LE: loop exit
PB: predicated region body
PF: predicated region fallthrough
CT: control target
= control target key end

     0   :  { %8 = vsyncpa [#allocation3], 0  ;;  %s177_s0 = inlined_call_operand.vmem [shape: f32[3,2], index: 0, kind: input, shape index: {}]   ;;  %s178_s1 = inlined_call_operand.vmem [shape: f32[3], index: 1, kind: input, shape index: {}]   ;;  %s179_s2 = inlined_call_operand.vmem [shape: f32[2,2], index: 2, kind: input, shape index: {}]   ;;  %s180_s3 = inlined_call_operand.vmem [shape: f32[9,2], index: 3, kind: output, shape index: {}]  }
   0x1   :  { %s15_s14 = sshll.u32 %s177_s0, 4  ;;  %s16_s14 = int_to_ptr.vmem [resolvable:$true] %s15_s14 }
   0x2   :  { %9 = vsyncpa [#allocation5], 0  ;;  %s24_s17 = sshll.u32 %s178_s1, 4  ;;  %s137_s18 = smov [#allocation2]   ;;  %s25_s17 = int_to_ptr.vmem [resolvable:$true] %s24_s17 }
   0x3   :  { %18 = dma.vmem_to_smem %s16_s14, 64, %s137_s18, [#allocation3]  }
   0x4   :  { %s138_s19 = smov [#allocation4]  }
   0x5   :  { %27 = dma.vmem_to_smem %s25_s17, 16, %s138_s19, [#allocation5]  }
   0x6   :  { %133 = dma.done.wait [#allocation3], 64  }
   0x7   :  { %134 = vsyncadd [#allocation3], 4294967232 }
   0x8   :  { %135 = dma.done.wait [#allocation5], 16  }
   0x9   :  { %136 = vsyncadd [#allocation5], 4294967280 }
   0xa   :  { %38 = sfence }
   0xb   :  { %s39_s20 = sld [smem:[#allocation4]]  ;;  %v41_v0 = vld [vmem:[%s179_s2] sm:$0x1]  ;;  %v47_v5 = vld [vmem:[%s179_s2 + $0x1] sm:$0x1]  ;;  %vm77_vm0 = vcmask 1040384  }
   0xc   :  { %s40_s21 = sld [smem:[#allocation2]]  ;;  %vm79_vm1 = vcmask 1041408   ;;  %vm86_vm2 = vcmask 1042432   ;;  %vm92_vm3 = vcmask 8192   ;;  %vm88_vm4 = vcmask 1045504  }
   0xd   :  { %s100_s22 = sld [smem:[#allocation2 + $0x1]]  ;;  %vm90_vm5 = vcmask 15360  }
   0xe   :  { %s101_s0 = sld [smem:[#allocation4 + $0x1]] }
   0xf   :  { %s102_s23 = sld [smem:[#allocation2 + $0x80]] }
  0x10   :  { %s103_s24 = sld [smem:[#allocation2 + $0x81]] }
  0x11   :  { %s104_s25 = sld [smem:[#allocation4 + $0x2]]  ;;  %v44_v3 = vstv %s39_s20 }
  0x12   :  { %v42_v1 = vstv %s40_s21  ;;  %s105_s1 = sld [smem:[#allocation2 + $0x100]] }
  0x13   :  { %v43_v2 = vmul.f32 %v42_v1, %v41_v0  ;;  %v48_v4 = vstv %s100_s22  ;;  %s106_s28 = sld [smem:[#allocation2 + $0x101]] }
  0x14   :  { %v55_v7 = vstv %s101_s0  ;;  %v49_v9 = vmul.f32 %v48_v4, %v47_v5 }
  0x15   :  { %v53_v6 = vstv %s102_s23  ;;  %v45_v8 = vadd.f32 %v44_v3, %v43_v2 }
  0x16   :  { %v54_v10 = vmul.f32 %v53_v6, %v41_v0  ;;  %v58_v11 = vstv %s103_s24 }
  0x17   :  { %v59_v12 = vmul.f32 %v58_v11, %v47_v5  ;;  %v65_v15 = vstv %s104_s25  ;;  %v50_v18 = vadd.f32 %v49_v9, %v45_v8 }
  0x18   :  { %v56_v13 = vadd.f32 %v55_v7, %v54_v10  ;;  %v63_v14 = vstv %s105_s1 }
  0x19   :  { %v64_v16 = vmul.f32 %v63_v14, %v41_v0  ;;  %v68_v17 = vstv %s106_s28 }
  0x1a   :  { %v60_v19 = vadd.f32 %v59_v12, %v56_v13  ;;  %v69_v20 = vmul.f32 %v68_v17, %v47_v5 }
  0x1b   :  { %v66_v21 = vadd.f32 %v65_v15, %v64_v16 }
  0x1c   :  { %v72_v22 = vrot.slane %v60_v19, 7 }
  0x1d   :  { %v70_v23 = vadd.f32 %v69_v20, %v66_v21 }
  0x1e   :  { %v78_v24 = vsel %vm77_vm0, %v50_v18, %v72_v22 }
  0x1f   :  { %v75_v25 = vrot.slane %v70_v23, 6 }
  0x21   :  { %v80_v26 = vsel %vm79_vm1, %v78_v24, %v75_v25 }
  0x22   :  { %v82_v27 = vrot.slane %v80_v26, 5  ;;  %v84_v28 = vrot.slane %v80_v26, 2 }
  0x24   :  { %v87_v29 = vsel %vm86_vm2, %v80_v26, %v82_v27  ;;  %93 = vst.msk [vmem:[%s180_s3 + $0x8] sm:$0x1] %vm92_vm3, %v84_v28 }
  0x25   :  { %v89_v30 = vsel %vm88_vm4, %v87_v29, %v84_v28 }
  0x26   :  { %91 = vst.msk [vmem:[%s180_s3] sm:$0xff] %vm90_vm5, %v89_v30 }
  0x27   :  { %98 = vsyncpa [#allocation3], 1 }
  0x28   :  { %99 = vsyncpa [#allocation5], 1 }

</bundles_post_ra>
